<compile_context>
chip_gen: v7x
topology: tpu7x:2x2x1
jax: 0.10.0
libtpu: 0.0.40
codegen_flags: <defaults>
</compile_context>

<pallas_src>
import jax
import jax.numpy as jnp
from jax.experimental import pallas as pl
from jax.experimental.pallas import tpu as pltpu


# ---------------------------------------------------------------------------
# Kernels: one (b, t) grid step computes
#   out[b, :, t*TNB:(t+1)*TNB] = W^T (out_sets, K) @ Xt[b, :, t*TNB:(t+1)*TNB]
# with the large nb dimension lane-dense in both the X tile and the output.
# ---------------------------------------------------------------------------
def _lcl_kernel(x_ref, w_ref, o_ref):
    # x_ref: (1, K, TNB) native-dtype tile ; w_ref: (out_sets, K) f32, resident
    # o_ref: (1, out_sets, TNB) f32
    x = x_ref[0].astype(jnp.float32)          # in-kernel upcast (VPU slot, ~free)
    o_ref[0] = jnp.dot(w_ref[...], x, preferred_element_type=jnp.float32)


def _lcl_bias_kernel(x_ref, w_ref, b_ref, o_ref):
    x = x_ref[0].astype(jnp.float32)
    acc = jnp.dot(w_ref[...], x, preferred_element_type=jnp.float32)
    o_ref[0] = acc + b_ref[...]               # (out_sets, 1) broadcasts over lanes


def locally_connected_forward(x, weight, bias=None, *, m, C, padding=True,
                              tile_nb=512):
    """Pallas implementation of LocallyConnectedLayer.forward.

    x:      (B, C, in_features), any float dtype (kept native for the DMA,
            upcast to f32 inside the kernel, matching PyTorch's .float()).
    weight: (1, kernel_size, out_sets) with kernel_size = m * C
    bias:   (1, out_sets) or None
    returns (B, out_sets, num_blocks) float32
    """
    B, C_in, F = x.shape
    assert C_in == C
    K = m * C
    out_sets = weight.shape[-1]
    assert weight.shape == (1, K, out_sets)

    # number of unfolded blocks (ceil if padding, floor otherwise: unfold drops tail)
    F_blk = ((F + m - 1) // m) * m if padding else (F // m) * m
    nb = F_blk // m
    assert nb > 0, "in_features too small for kernel window"

    # ---- layout-only glue: native dtype, no f32 upcast, no output transpose ----
    if F_blk > F:
        x = jnp.pad(x, ((0, 0), (0, 0), (0, F_blk - F)))
    elif F_blk < F:
        x = x[:, :, :F_blk]
    # (B, C, nb, m) is a free reshape of the native layout; the single transpose
    # below builds Xt[b, j*C + c, k] = x[b, c, k*m + j], i.e. the unfolded blocks
    # already transposed so the kernel output is lane-dense.
    # TODO(synk): this channel-interleaved unfold (one transpose) is left to XLA;
    # doing it in-kernel needs lane-strided gathers with no robust Mosaic lowering.
    xt = x.reshape(B, C, nb, m)
    xt = jnp.transpose(xt, (0, 3, 1, 2)).reshape(B, K, nb)

    # nb tiling: lane-dense tiles, multiple of 128, capped at `tile_nb`
    nb_128 = ((nb + 127) // 128) * 128
    tnb = max(128, (min(tile_nb, nb_128) // 128) * 128)
    nb_pad = ((nb + tnb - 1) // tnb) * tnb
    if nb_pad > nb:
        xt = jnp.pad(xt, ((0, 0), (0, 0), (0, nb_pad - nb)))
    n_tiles = nb_pad // tnb

    w_t = jnp.transpose(weight[0]).astype(jnp.float32)           # (out_sets, K)

    in_specs = [
        pl.BlockSpec((1, K, tnb), lambda b, t: (b, 0, t)),       # X tile
        pl.BlockSpec((out_sets, K), lambda b, t: (0, 0)),        # resident weight
    ]
    args = [xt, w_t]
    kernel = _lcl_kernel
    if bias is not None:
        b_t = bias.reshape(out_sets, 1).astype(jnp.float32)      # lane-broadcast form
        in_specs.append(pl.BlockSpec((out_sets, 1), lambda b, t: (0, 0)))
        args.append(b_t)
        kernel = _lcl_bias_kernel

    out = pl.pallas_call(
        kernel,
        out_shape=jax.ShapeDtypeStruct((B, out_sets, nb_pad), jnp.float32),
        grid=(B, n_tiles),
        in_specs=in_specs,
        out_specs=pl.BlockSpec((1, out_sets, tnb), lambda b, t: (b, 0, t)),
        compiler_params=pltpu.CompilerParams(
            dimension_semantics=("parallel", "parallel"),
            vmem_limit_bytes=32 * 1024 * 1024,
        ),
    )(*args)

    # drop nb padding (output is already in the final (B, out_sets, nb) layout)
    return out[:, :, :nb] if nb_pad > nb else out


def _reference_forward(x, weight, bias=None, *, m, C, padding=True):
    """Pure-JAX reference mirroring the PyTorch module exactly."""
    B, _, F = x.shape
    K = m * C
    pad = ((m - F % m) % m) * C if padding else 0
    xf = x.astype(jnp.float32)
    xf = jnp.transpose(xf, (0, 2, 1)).reshape(B, F * C)
    xf = jnp.pad(xf, ((0, 0), (0, pad)))
    nb = xf.shape[1] // K
    xf = xf[:, : nb * K].reshape(B, nb, K)
    out = jnp.matmul(xf, weight[0])
    if bias is not None:
        out = out + bias
    return jnp.transpose(out, (0, 2, 1))


if __name__ == "__main__":
    # Small deterministic setup; 130 % 4 != 0 exercises the padding branch.
    B, C, in_features, m, out_sets = 2, 4, 130, 4, 4
    kernel_size = m * C  # 16

    key = jax.random.PRNGKey(0)
    kx, kw, kb = jax.random.split(key, 3)
    x = jax.random.normal(kx, (B, C, in_features), dtype=jnp.float32)
    weight = jax.random.normal(kw, (1, kernel_size, out_sets), dtype=jnp.float32)
    bias = jax.random.normal(kb, (1, out_sets), dtype=jnp.float32)

    # default module config (bias=False)
    out = locally_connected_forward(x, weight, None, m=m, C=C, padding=True)
    out = jax.block_until_ready(out)
    ref = _reference_forward(x, weight, None, m=m, C=C, padding=True)
    assert out.shape == ref.shape, (out.shape, ref.shape)
    assert jnp.allclose(out, ref, atol=1e-5, rtol=1e-5), "mismatch vs reference (no bias)"

    # bias=True branch
    out_b = locally_connected_forward(x, weight, bias, m=m, C=C, padding=True)
    out_b = jax.block_until_ready(out_b)
    ref_b = _reference_forward(x, weight, bias, m=m, C=C, padding=True)
    assert out_b.shape == ref_b.shape, (out_b.shape, ref_b.shape)
    assert jnp.allclose(out_b, ref_b, atol=1e-5, rtol=1e-5), "mismatch vs reference (bias)"

    print("KERNEL_OK")
</pallas_src>

<mosaic_0001>
module attributes {stable_mosaic.version = 11 : i64} {
  func.func @_lcl_kernel(%arg0: i32, %arg1: i32, %arg2: memref<1x16x128xf32, #tpu.memory_space<vmem>>, %arg3: memref<4x16xf32, #tpu.memory_space<vmem>>, %arg4: memref<1x4x128xf32, #tpu.memory_space<vmem>>) attributes {dimension_semantics = [#tpu.dimension_semantics<parallel>, #tpu.dimension_semantics<parallel>], iteration_bounds = array<i64: 2, 1>, scalar_prefetch = 0 : i64, scratch_operands = 0 : i64, tpu.core_type = #tpu.core_type<tc>, window_params = [{transform_indices = @transform_0, window_bounds = array<i64: 1, 16, 128>}, {pipeline_mode = #tpu.pipeline_mode<synchronous>, transform_indices = @transform_1, window_bounds = array<i64: 4, 16>}, {transform_indices = @transform_2, window_bounds = array<i64: 1, 4, 128>}]} {
    %c0 = arith.constant 0 : index
    %c0_0 = arith.constant 0 : index
    %c0_1 = arith.constant 0 : index
    %0 = vector.load %arg2[%c0, %c0_0, %c0_1] : memref<1x16x128xf32, #tpu.memory_space<vmem>>, vector<1x16x128xf32>
    %1 = vector.shape_cast %0 : vector<1x16x128xf32> to vector<16x128xf32>
    %c0_2 = arith.constant 0 : index
    %c0_3 = arith.constant 0 : index
    %2 = vector.load %arg3[%c0_2, %c0_3] : memref<4x16xf32, #tpu.memory_space<vmem>>, vector<4x16xf32>
    %cst = arith.constant dense<0.000000e+00> : vector<4x128xf32>
    %3 = tpu.matmul %2, %1, %cst {dimension_numbers = #tpu.dot_dimension_numbers<[1], [0], [0], [1], [0, 0, 1, 1], [], []>} : vector<4x16xf32>, vector<16x128xf32>, vector<4x128xf32> -> vector<4x128xf32>
    %c0_4 = arith.constant 0 : index
    %c0_5 = arith.constant 0 : index
    %c0_6 = arith.constant 0 : index
    %4 = vector.load %arg4[%c0_4, %c0_5, %c0_6] : memref<1x4x128xf32, #tpu.memory_space<vmem>>, vector<1x4x128xf32>
    %5 = vector.shape_cast %4 : vector<1x4x128xf32> to vector<4x128xf32>
    %6 = vector.shape_cast %3 : vector<4x128xf32> to vector<1x4x128xf32>
    tpu.vector_store %arg4[%c0_4, %c0_5, %c0_6], %6 {strides = array<i32>} : memref<1x4x128xf32, #tpu.memory_space<vmem>>, vector<1x4x128xf32>,
    return
  }
  func.func @transform_0(%arg0: i32, %arg1: i32) -> (i32, i32, i32) {
    %c0_i32 = arith.constant 0 : i32
    %c0_i32_0 = arith.constant 0 : i32
    return %arg0, %c0_i32, %arg1 : i32, i32, i32
  }
  func.func @transform_1(%arg0: i32, %arg1: i32) -> (i32, i32) {
    %c0_i32 = arith.constant 0 : i32
    %c0_i32_0 = arith.constant 0 : i32
    %c0_i32_1 = arith.constant 0 : i32
    return %c0_i32, %c0_i32_0 : i32, i32
  }
  func.func @transform_2(%arg0: i32, %arg1: i32) -> (i32, i32, i32) {
    %c0_i32 = arith.constant 0 : i32
    %c0_i32_0 = arith.constant 0 : i32
    return %arg0, %c0_i32, %arg1 : i32, i32, i32
  }
}

</mosaic_0001>

<bundles_post_ra>
// kernel: tpu_custom_call.1
= control target key start
LH: loop header
LB: loop body
LE: loop exit
PB: predicated region body
PF: predicated region fallthrough
CT: control target
= control target key end

     0   :  { %7 = vsyncpa [#allocation3], 0  ;;  %s874_s0 = inlined_call_operand.hbm [shape: f32[2,16,128], index: 0, kind: input, shape index: {}]   ;;  %s875_s1 = inlined_call_operand.hbm [shape: f32[4,16], index: 1, kind: input, shape index: {}]   ;;  %s876_s2 = inlined_call_operand.hbm [shape: f32[2,4,128], index: 2, kind: output, shape index: {}]  }
   0x1   :  { %9 = vsyncpa [#allocation3 + $0x1], 0 }
   0x2   :  { %10 = vsyncpa [#allocation6], 0 }
   0x3   :  { %11 = vsyncpa [#allocation4], 0 }
   0x4   :  { %13 = vsyncpa [#allocation4 + $0x1], 0  ;;  %s654_s9 = smov 0   ;;  %s656_s10 = smov 0  }
   0x5   :  { %s658_s11 = smov 0   ;;  %s660_s12 = smov 0  }
   0x6   :  { %s662_s13 = smov 0   ;;  %s664_s14 = smov 0  }
   0x7 LB: > { %s376_s15 = sadd.s32 4294967295, %s629_s14   ;;  %s377_s16 = sadd.s32 4294967294, %s629_s14   ;;  %s629_s14 = sphi %s664_s14, %s19_s14   ;;  %s625_s13 = sphi %s662_s13, %s904_s13   ;;  %s621_s12 = sphi %s660_s12, %s903_s12   ;;  %s617_s11 = sphi %s658_s11, %s902_s11   ;;  %s613_s10 = sphi %s656_s10, %s901_s10   ;;  %s609_s9 = sphi %s654_s9, %s900_s9  }
   0x8   : > { %s40_s17 = sadd.s32 1, %s617_s11  ;;  %p47_p0 = scmp.ne.s32.totalorder %s617_s11, %s613_s10 }
   0x9   : > { %p48_p1 = scmp.eq.s32.totalorder %s629_s14, 0  ;;  %p53_p2 = scmp.ne.s32.totalorder %s613_s10, %s609_s9 }
   0xa   : > { %p692_p3 = scmp.eq.s32.totalorder %s376_s15, 0  ;;  %p100_p4 = scmp.eq.s32.totalorder %s376_s15, 1 }
   0xb   : > { %p696_p5 = por %p48_p1, %p47_p0  ;;  %p106_p6 = scmp.eq.s32.totalorder %s377_s16, 1 }
   0xc   : > { %s883_s18 = scalar_select %p692_p3, 1, 0 }
   0xd   : > { %p702_p7 = por %p692_p3, %p53_p2  ;;  %p706_p8 = por %p100_p4, %p47_p0 }
   0xe   : > { %p710_p9 = por %p106_p6, %p53_p2  ;;  %p378_p10 = scmp.ge.s32.totalorder %s629_s14, 1 }
   0xf   : > { %s885_s20 = scalar_select %p702_p7, 1, 0 }
  0x10   : > { %s886_s21 = scalar_select %p706_p8, 1, 0 }
  0x11   : > { %s887_s22 = scalar_select %p710_p9, 1, 0 }
  0x12   : > { %p113_p11 = scmp.lt.s32.totalorder %s629_s14, 3  ;;  %s631_s24 = smov [#allocation5]  }
  0x13   : > { %s126_s25 = sshll.u32 %s631_s24, 4  ;;  %p428_p1 = scmp.lt.s32.totalorder %s629_s14, 2  ;;  %s127_s25 = int_to_ptr.vmem [resolvable:$true] %s126_s25 }
  0x14   : > { %p717_p13 = pnand %p378_p10, %p113_p11  ;;  %s31_s28 = sadd.s32 1, %s625_s13 }
  0x15   : > { %p726_p4 = pnand %p428_p1, %p696_p5  ;;  %p737_p6 = scmp.ge.s32.totalorder %s31_s28, 2 }
  0x16   : > { %s888_s23 = scalar_select %p717_p13, 1, 0 }
  0x17   : > { %p415_p0 = pneg %p717_p13  ;;  %s137_s30 = sand.u32 1, %s617_s11  }
  0x18   : > { %s889_s26 = scalar_select %p726_p4, 1, 0 }
  0x19   : > { %p732_p2 = pnand %p415_p0, %p692_p3  ;;  %s485_s5 = scalar_lea.hbm %s875_s1, 64 }
  0x1a   : > { %s891_s29 = scalar_select %p737_p6, 1, 0 }
  0x1b   : > { %p486_p5 = scmp.ne.s32.totalorder %s875_s1, %s485_s5  ;;  %p487_p10 = pneg %p732_p2 }
  0x1c   : > { %p492_p0 = scmp.lt.u32.totalorder %s485_s5, %s875_s1 }
  0x1d   : > { %p488_p11 = pnand %p487_p10, %p486_p5 }
  0x1f   : > { %p489_p1 = pneg %p488_p11 }
  0x21   : > { %p494_p12 = pnand %p492_p0, %p489_p1 }
  0x23   : > { %497 = shalt.err (!%p494_p12)
}
  0x24   : > { %s498_s16 = scalar_lea.vmem %s127_s25, 64  ;;  %p506_p7 = scmp.lt.s32.totalorder %s127_s25, %s127_s25 }
  0x25   : > { %p499_p9 = scmp.ne.s32.totalorder %s127_s25, %s498_s16  ;;  %p507_p13 = scmp.lt.s32.totalorder %s498_s16, %s498_s16 }
  0x27   : > { %p501_p8 = pnand %p499_p9, %p487_p10  ;;  %p508_p4 = por %p507_p13, %p506_p7 }
  0x29   : > { %p502_p3 = pneg %p501_p8 }
  0x2b   : > { %p509_p6 = pnand %p508_p4, %p502_p3 }
  0x2d   : > { %512 = shalt.err (!%p509_p6)
}
  0x2e   : > { %418 = dma.hbm_to_vmem [thread:$0]  (!%p732_p2), %s875_s1, 64, %s127_s25, [#allocation6]  }
  0x2f   : > { %p892_p9 = scmp.ne.s32.totalorder %s891_s29, 0  ;;  %s381_s3 = sshll.u32 %s137_s30, 4 }
  0x30   : > { %s393_s5 = sshll.u32 %s625_s13, 8  ;;  %s141_s8 = scalar_lea.vmem [#allocation2], %s381_s3 }
  0x31   : > { %s906_s28 = smov (%p892_p9, %s31_s28), 0  ;;  %s768_s7 = scalar_lea.hbm %s874_s0, %s393_s5 }
  0x32   : > { %s35_s4 = ssub.s32 %s625_s13, %s906_s28  ;;  %s149_s15 = sshll.u32 %s141_s8, 4  ;;  %s775_s15 = int_to_ptr.vmem [resolvable:$true] %s149_s15 }
  0x33   : > { %p38_p3 = scmp.eq.s32.totalorder %s35_s4, 0  ;;  %s777_s29 = scalar_lea.sflag [#allocation3], %s137_s30 }
  0x34   : > { %s513_s16 = scalar_lea.hbm %s768_s7, 256  ;;  %p893_p8 = scmp.ne.s32.totalorder %s889_s26, 0 }
  0x35   : > { %s773_s25 = scalar_select %p38_p3, %s617_s11, %s40_s17  }
  0x36   : > { %p514_p7 = scmp.ne.s32.totalorder %s768_s7, %s513_s16  ;;  %p515_p12 = pneg %p893_p8 }
  0x37   : > { %s518_s3 = scalar_lea.hbm %s874_s0, 512  ;;  %p519_p2 = scmp.lt.u32.totalorder %s768_s7, %s874_s0 }
  0x38   : > { %p516_p13 = pnand %p515_p12, %p514_p7  ;;  %p520_p6 = scmp.lt.u32.totalorder %s518_s3, %s513_s16 }
  0x39   : > { %p522_p10 = scmp.lt.u32.totalorder %s513_s16, %s768_s7 }
  0x3a   : > { %p517_p4 = pneg %p516_p13  ;;  %p521_p5 = por %p520_p6, %p519_p2 }
  0x3c   : > { %p523_p11 = por %p522_p10, %p521_p5 }
  0x3e   : > { %p524_p1 = pnand %p523_p11, %p517_p4 }
  0x40   : > { %527 = shalt.err (!%p524_p1)
}
  0x41   : > { %s528_s17 = scalar_lea.vmem %s775_s15, 256  ;;  %s632_s30 = smov [#allocation2]  }
  0x42   : > { %p529_p0 = scmp.ne.s32.totalorder %s775_s15, %s528_s17  ;;  %s533_s27 = sshll.u32 %s632_s30, 4  ;;  %s534_s27 = int_to_ptr.vmem [resolvable:$false] %s533_s27 }
  0x43   : > { %s535_s6 = scalar_lea.vmem %s534_s27, 512  ;;  %p536_p7 = scmp.lt.s32.totalorder %s775_s15, %s534_s27 }
  0x44   : > { %p531_p9 = pnand %p529_p0, %p515_p12  ;;  %p537_p13 = scmp.lt.s32.totalorder %s535_s6, %s528_s17 }
  0x46   : > { %p532_p3 = pneg %p531_p9  ;;  %p538_p2 = por %p537_p13, %p536_p7 }
  0x48   : > { %p539_p6 = pnand %p538_p2, %p532_p3 }
  0x4a   : > { %542 = shalt.err (!%p539_p6)
}
  0x4b   : > { %s633_s8 = smov 128   ;;  %s634_s16 = smov 8  }
  0x4c   : > { %422 = dma.hbm_to_vmem [thread:$0]  (!%p893_p8), %s768_s7, 256, %s775_s15, %s777_s29, %s633_s8, %s633_s8, %s634_s16  }
  0x4d   : > { %p894_p12 = scmp.ne.s32.totalorder %s888_s23, 0 }
  0x4e   : > { %s808_s19 = sand.u32 (!%p894_p12), 1, %s613_s10   ;;  %p895_p4 = scmp.ne.s32.totalorder (!%p894_p12), %s885_s20, 0 }
  0x4f   : > { %161 = sbr.rel (%p894_p12) target bundleno = 323 (0x143), region = 28  ;;  %s385_s24 = sshll.u32 (!%p894_p12), %s808_s19, 4 }
  0x50   : > { %s164_s3 = scalar_lea.sflag (!%p894_p12), [#allocation3], %s808_s19  ;;  %s167_s4 = scalar_lea.vmem (!%p894_p12), [#allocation2], %s385_s24 }
  0x56   : > { %596 = dma.done.wait (%p895_p4), %s164_s3, 256  }
  0x57   : > { %598 = vsyncadd (%p895_p4), %s164_s3, 4294967040  ;;  %p896_p5 = scmp.ne.s32.totalorder %s883_s18, 0 }
  0x59   : > { %600 = dma.done.wait (%p896_p5), [#allocation6], 64  }
  0x5a   : > { %602 = vsyncadd (%p896_p5), [#allocation6], 4294967232  ;;  %v635_v0 = vmov 0.0|0.0   ;;  %vm636_vm0 = vmmov 0   ;;  %v637_v1 = vmov 0.0   ;;  %v192_v2 = vld [vmem:[%s167_s4] sm:$0xff] }
  0x5b   : > { %404 = vmatprep.subr.bf16.mxu0 %v635_v0  ;;  %401 = vmatprep.mubr.msk.f32.mxu0 %vm636_vm0, %v637_v1  ;;  %v193_v3 = vld [vmem:[%s167_s4 + $0x8] sm:$0xff]  ;;  %v194_v5 = vld [vmem:[#allocation5] sm:$0xf]  ;;  %vm195_vm1 = vcmask 130048   ;;  %s387_s20 = sshll.u32 %s808_s19, 2  ;;  %s390_s26 = sshll.u32 %s621_s12, 6 }
  0x5c   : > { %v405_v4 = vpack.c.bf16 %v193_v3, %v192_v2  ;;  %s191_s23 = scalar_lea.vmem [#allocation7], %s387_s20  ;;  %s827_s29 = scalar_lea.hbm %s876_s2, %s390_s26 }
  0x5d   : > { %s285_s18 = sshll.u32 %s191_s23, 4  ;;  %s271_s5 = scalar_lea.sflag [#allocation4], %s808_s19  ;;  %s822_s18 = int_to_ptr.vmem [resolvable:$true] %s285_s18 }
  0x5e   : > { %406 = vmatpush3.bf16.msra.mxu0 %v405_v4  ;;  %s543_s17 = scalar_lea.vmem %s822_s18, 64  ;;  %p897_p10 = scmp.ne.s32.totalorder %s886_s21, 0 }
  0x5f   : > { %p544_p8 = scmp.ne.s32.totalorder %s822_s18, %s543_s17  ;;  %s638_s12 = smov [#allocation7]  }
  0x60   : > { %s547_s30 = sshll.u32 %s638_s12, 4  ;;  %s548_s30 = int_to_ptr.vmem [resolvable:$false] %s547_s30 }
  0x61   : > { %402 = vmatmul.mubr.msk.f32.vlgmr.msra.gmra.mrb[0].mxu0 %vm195_vm1, %v194_v5  ;;  %p545_p11 = pnand %p544_p8, %p897_p10  ;;  %s549_s27 = scalar_lea.vmem %s548_s30, 128 }
  0x62   : > { %p550_p0 = scmp.lt.s32.totalorder %s822_s18, %s548_s30  ;;  %p551_p9 = scmp.lt.s32.totalorder %s549_s27, %s543_s17 }
  0x63   : > { %p546_p1 = pneg %p545_p11 }
  0x64   : > { %p552_p3 = por %p551_p9, %p550_p0 }
  0x66   : > { %p553_p7 = pnand %p552_p3, %p546_p1 }
 0x134   : > { %v265_v6 = vpop.f32.mrb[0].mxu0 }
 0x135   : > { %269 = vst [vmem:[%s191_s23] sm:$0xf] %v265_v6  ;;  %v403_v7 = vpop.f32.mrb[1].mxu0 }
 0x136   : > { %556 = shalt.err (!%p553_p7)
}
 0x137   : > { %s557_s6 = scalar_lea.hbm %s827_s29, 64  ;;  %s561_s19 = scalar_lea.hbm %s876_s2, 128 }
 0x138   : > { %p558_p13 = scmp.ne.s32.totalorder %s827_s29, %s557_s6  ;;  %p562_p12 = scmp.lt.u32.totalorder %s827_s29, %s876_s2 }
 0x139   : > { %p563_p4 = scmp.lt.u32.totalorder %s561_s19, %s557_s6  ;;  %p565_p8 = scmp.lt.u32.totalorder %s557_s6, %s827_s29 }
 0x13a   : > { %p559_p2 = pnand %p558_p13, %p897_p10 }
 0x13b   : > { %p564_p5 = por %p563_p4, %p562_p12 }
 0x13c   : > { %p560_p6 = pneg %p559_p2 }
 0x13d   : > { %p566_p11 = por %p565_p8, %p564_p5 }
 0x13f   : > { %p567_p1 = pnand %p566_p11, %p560_p6 }
 0x141   : > { %570 = shalt.err (!%p567_p1)
}
 0x142   : > { %413 = dma.vmem_to_hbm [thread:$0]  (%p897_p10), %s822_s18, 64, %s827_s29, %s271_s5  }
 0x143 PF: > { %s297_s4 = sand.u32 1, %s609_s9   ;;  %p898_p0 = scmp.ne.s32.totalorder %s887_s22, 0 }
 0x144   : > { %p899_p9 = scmp.ge.s32.totalorder %s629_s14, 2  ;;  %s298_s20 = scalar_lea.sflag [#allocation4], %s297_s4 }
 0x146   : > { %p424_p3 = pnand %p899_p9, %p898_p0 }
 0x148   : > { %604 = dma.done.wait (!%p424_p3), %s298_s20, 64  }
 0x149   : > { %606 = vsyncadd (!%p424_p3), %s298_s20, 4294967232  ;;  %s19_s14 = sadd.s32 1, %s629_s14   ;;  %s900_s9 = smov %s613_s10 }
 0x14a   : > { %p16_p7 = scmp.ge.s32.totalorder %s19_s14, 4   ;;  %s901_s10 = smov %s617_s11 }
 0x14b   : > { %s902_s11 = smov %s773_s25  ;;  %s903_s12 = smov %s625_s13 }
 0x14c   : > { %s904_s13 = smov %s906_s28  ;;  %18 = sbr.rel (!%p16_p7) target bundleno = 7 (0x7), region = 77 }
 0x153   :  { %303 = vsyncpa [#allocation3], 1 }
 0x154   :  { %305 = vsyncpa [#allocation3 + $0x1], 1 }
 0x155   :  { %306 = vsyncpa [#allocation6], 1 }
 0x156   :  { %307 = vsyncpa [#allocation4], 1 }
 0x157   :  { %309 = vsyncpa [#allocation4 + $0x1], 1 }

</bundles_post_ra>
